<compile_context>
chip_gen: v6e
topology: v6e:2x2x1
jax: 0.10.0
libtpu: 0.0.40
codegen_flags: <defaults>
</compile_context>

<pallas_src>
from functools import partial

import jax
import jax.numpy as jnp
from jax.experimental import pallas as pl
from jax.experimental.pallas import tpu as pltpu

_MIB = 1024 * 1024
_NEG_BIG = -1e30                    # finite "-inf" for padded vocab columns
_DEFAULT_VMEM_LIMIT = 32 * _MIB     # Mosaic scoped-VMEM default


def _round_up(n, m):
    return ((n + m - 1) // m) * m


def _vmem_budget_bytes():
    """Usable VMEM budget: ~85% of physical per-core VMEM, with a conservative
    64 MiB (v7x-sized) fallback if the hardware query is unavailable."""
    try:
        return int(pltpu.get_tpu_info().vmem_capacity_bytes * 0.85)
    except Exception:
        return 64 * _MIB


def _vmem_estimate(tm, tn, v_pad, h, in_bytes, out_bytes):
    x_buf = 2 * tm * h * in_bytes            # double-buffered x row tile
    w_buf = 2 * h * tn * in_bytes            # double-buffered weight slab
    b_buf = 2 * tn * 4                       # double-buffered bias slab
    o_buf = 2 * tm * v_pad * out_bytes       # double-buffered output row slab
    scratch = tm * v_pad * 4 + 2 * tm * 4    # f32 logits slab + running max/sum
    return x_buf + w_buf + b_buf + o_buf + scratch


def _pick_tm(m, tn, v_pad, h, in_bytes, out_bytes, budget):
    """Largest row tile (multiple of 8, capped by M) whose footprint fits."""
    tm_cap = _round_up(m, 8)
    for tm in (1024, 512, 256, 128, 64, 32, 16, 8):
        tm = min(tm, tm_cap)
        if _vmem_estimate(tm, tn, v_pad, h, in_bytes, out_bytes) <= budget:
            return tm
    # TODO(synk): fall back to a 2-pass (recompute-logits) formulation for
    # vocabularies whose (8, V_pad) f32 row slab still does not fit VMEM.
    return min(8, tm_cap)


# ---------------------------------------------------------------------------
# MaskedLanguageModel head (fused matmul + online log-softmax)
# ---------------------------------------------------------------------------
def prepare_mlm_params(weight, bias, *, tn=2048, compute_dtype=jnp.bfloat16):
    """One-time MLM parameter prep. Do this OUTSIDE the per-step jit.

    * transposes the PyTorch (V, H) weight to the canonical MXU orientation
      (H, V) so the kernel issues (tm, H) x (H, tn) matmuls,
    * pads V up to a multiple of the vocab tile tn (full, lane-dense tiles; no
      per-step masking); padded bias columns get a large negative so they never
      win the max nor contribute to the sum-exp,
    * casts the weight to bf16 once instead of re-casting it every call.
    Returns (weight_t_padded [H, V_pad], bias_padded [1, V_pad], tn_effective).
    """
    v, h = weight.shape
    tn_eff = min(tn, _round_up(v, 128))
    v_pad = _round_up(v, tn_eff)
    w_t = jnp.zeros((h, v_pad), compute_dtype)
    w_t = w_t.at[:, :v].set(weight.T.astype(compute_dtype))
    b = jnp.full((1, v_pad), _NEG_BIG, jnp.float32)
    b = b.at[:, :v].set(bias.reshape(1, v).astype(jnp.float32))
    return w_t, b, tn_eff


def masked_language_model(x, weight_t, bias_pad, vocab_size, *, tn,
                          tm=None, out_dtype=jnp.bfloat16,
                          vmem_budget_bytes=None):
    """log_softmax(x @ W^T + b, axis=-1) -> (B, S, vocab_size).

    x:        (B, S, H) backbone activations.
    weight_t: (H, V_pad) pre-transposed / padded / bf16 weight (prepare_mlm_params).
    bias_pad: (1, V_pad) f32 bias (padded columns = -1e30).
    """
    B, S, H = x.shape
    Hw, V_pad = weight_t.shape
    assert Hw == H and V_pad % tn == 0 and tn % 128 == 0
    M = B * S
    V = vocab_size

    compute_dtype = weight_t.dtype
    x2d = x.reshape(M, H).astype(compute_dtype)

    in_bytes = jnp.dtype(compute_dtype).itemsize
    out_bytes = jnp.dtype(out_dtype).itemsize
    budget = vmem_budget_bytes or _vmem_budget_bytes()
    if tm is None:
        tm = _pick_tm(M, tn, V_pad, H, in_bytes, out_bytes, budget)
    tm = min(tm, _round_up(M, 8))

    nm = pl.cdiv(M, tm)
    nv = V_pad // tn

    def kernel(x_ref, w_ref, b_ref, o_ref, m_scr, l_scr, logits_scr):
        j = pl.program_id(1)

        @pl.when(j == 0)
        def _init():
            m_scr[...] = jnp.full_like(m_scr, -jnp.inf)
            l_scr[...] = jnp.zeros_like(l_scr)

        # Canonical (tm, H) x (H, tn) MXU matmul, f32 accumulation.
        logits = jnp.dot(x_ref[...], w_ref[...],
                         preferred_element_type=jnp.float32) + b_ref[...]

        # Online (flash-style) running max / sum-exp over the vocab axis.
        m_prev = m_scr[...]
        m_new = jnp.maximum(m_prev, jnp.max(logits, axis=-1, keepdims=True))
        l_scr[...] = (l_scr[...] * jnp.exp(m_prev - m_new)
                      + jnp.sum(jnp.exp(logits - m_new), axis=-1, keepdims=True))
        m_scr[...] = m_new

        # Stash the f32 logits tile in the row-resident slab (no recompute pass).
        col0 = pl.multiple_of(j * tn, 128)
        logits_scr[:, pl.ds(col0, tn)] = logits

        @pl.when(j == nv - 1)
        def _finalize():
            lse = m_scr[...] + jnp.log(l_scr[...])
            o_ref[...] = (logits_scr[...] - lse).astype(o_ref.dtype)

    est = _vmem_estimate(tm, tn, V_pad, H, in_bytes, out_bytes)
    cp_kwargs = dict(dimension_semantics=("parallel", "arbitrary"))
    if est + 4 * _MIB > _DEFAULT_VMEM_LIMIT:
        # v7x (64 MiB physical, 32 MiB scoped default) needs this raised
        # explicitly; harmless on v5e/v6e.
        cp_kwargs["vmem_limit_bytes"] = int(min(budget, est + 8 * _MIB))

    out2d = pl.pallas_call(
        kernel,
        out_shape=jax.ShapeDtypeStruct((M, V_pad), out_dtype),
        grid_spec=pltpu.PrefetchScalarGridSpec(
            num_scalar_prefetch=0,
            grid=(nm, nv),
            in_specs=[
                pl.BlockSpec((tm, H), lambda i, j: (i, 0)),   # x row tile (constant over j)
                # NOTE(v5e/v6e): with 128 MiB VMEM, tn=4096 and/or
                # pipeline_mode=pl.Buffered(3) on this spec hides weight-DMA jitter.
                pl.BlockSpec((H, tn), lambda i, j: (0, j)),   # weight vocab slab
                pl.BlockSpec((1, tn), lambda i, j: (0, j)),   # bias slab
            ],
            # Output row slab is resident across the "arbitrary" vocab axis and
            # written back once per row tile: lane-dense, unmasked stores.
            out_specs=pl.BlockSpec((tm, V_pad), lambda i, j: (i, 0)),
            scratch_shapes=[
                pltpu.VMEM((tm, 1), jnp.float32),        # running max
                pltpu.VMEM((tm, 1), jnp.float32),        # running sum-exp
                pltpu.VMEM((tm, V_pad), jnp.float32),    # f32 logits row slab
            ],
        ),
        compiler_params=pltpu.CompilerParams(**cp_kwargs),
    )(x2d, weight_t, bias_pad)

    # Drop padded vocab columns (no-op copy when V is already a multiple of tn).
    return out2d[:, :V].reshape(B, S, V)


# ---------------------------------------------------------------------------
# NextSentencePrediction head (tiny 2-class -> single-block kernel)
# ---------------------------------------------------------------------------
def _nsp_kernel(x_ref, w_ref, b_ref, o_ref):
    logits = jnp.dot(x_ref[...], w_ref[...],
                     preferred_element_type=jnp.float32) + b_ref[...]
    m = jnp.max(logits, axis=-1, keepdims=True)
    shifted = logits - m
    lse = jnp.log(jnp.sum(jnp.exp(shifted), axis=-1, keepdims=True))
    o_ref[...] = shifted - lse


def next_sentence_prediction(x, weight, bias):
    """log_softmax(x[:, 0] @ weight.T + bias, axis=-1); weight: (2, H).

    Kept as a trivial single-block kernel for completeness; per the perf review
    this head is negligible and in production one would let XLA fuse it.
    """
    x0 = x[:, 0, :].astype(jnp.float32)
    B, _ = x0.shape
    C = weight.shape[0]
    w_t = weight.T.astype(jnp.float32)            # (H, 2) canonical orientation
    b = bias.reshape(1, C).astype(jnp.float32)
    return pl.pallas_call(
        _nsp_kernel,
        out_shape=jax.ShapeDtypeStruct((B, C), jnp.float32),
    )(x0, w_t, b)


# ---------------------------------------------------------------------------
# BERTLM forward over the heads (BERT backbone activations passed in as x)
# ---------------------------------------------------------------------------
@partial(jax.jit, static_argnames=("vocab_size", "tn"))
def bert_lm_heads(x, nsp_weight, nsp_bias, mlm_weight_t, mlm_bias_pad,
                  vocab_size, tn):
    return (next_sentence_prediction(x, nsp_weight, nsp_bias),
            masked_language_model(x, mlm_weight_t, mlm_bias_pad,
                                  vocab_size, tn=tn))


if __name__ == "__main__":
    # Small shapes consistent with the module: hidden=32, vocab=128, B=2, S=8.
    B, S, H, V = 2, 8, 32, 128

    key = jax.random.PRNGKey(0)
    kx, kw, kb, kw2, kb2 = jax.random.split(key, 5)
    x = jax.random.normal(kx, (B, S, H), dtype=jnp.float32)
    mlm_w = jax.random.normal(kw, (V, H), dtype=jnp.float32) * 0.05   # (V, H) torch layout
    mlm_b = jax.random.normal(kb, (V,), dtype=jnp.float32) * 0.05
    nsp_w = jax.random.normal(kw2, (2, H), dtype=jnp.float32) * 0.05  # (2, H)
    nsp_b = jax.random.normal(kb2, (2,), dtype=jnp.float32) * 0.05

    # One-time weight prep (transpose / pad / bf16 cast) outside the jitted step.
    mlm_wt, mlm_bp, tn_eff = prepare_mlm_params(mlm_w, mlm_b, tn=2048)

    nsp_out, mlm_out = bert_lm_heads(x, nsp_w, nsp_b, mlm_wt, mlm_bp,
                                     vocab_size=V, tn=tn_eff)
    nsp_out, mlm_out = jax.block_until_ready((nsp_out, mlm_out))

    # Pure-JAX references.
    ref_mlm = jax.nn.log_softmax(x @ mlm_w.T + mlm_b, axis=-1)
    ref_nsp = jax.nn.log_softmax(x[:, 0] @ nsp_w.T + nsp_b, axis=-1)

    assert mlm_out.shape == (B, S, V)
    assert nsp_out.shape == (B, 2)
    # bf16 MXU inputs + bf16 log-prob output in the MLM head -> relaxed tolerance.
    assert jnp.allclose(mlm_out.astype(jnp.float32), ref_mlm, atol=3e-2, rtol=3e-2)
    assert jnp.allclose(nsp_out, ref_nsp, atol=1e-2, rtol=1e-2)

    print("KERNEL_OK")
</pallas_src>

<mosaic_0001>
module attributes {stable_mosaic.version = 11 : i64} {
  func.func @kernel(%arg0: i32, %arg1: i32, %arg2: memref<16x32xbf16, #tpu.memory_space<vmem>>, %arg3: memref<32x128xbf16, #tpu.memory_space<vmem>>, %arg4: memref<1x128xf32, #tpu.memory_space<vmem>>, %arg5: memref<16x128xbf16, #tpu.memory_space<vmem>>, %arg6: memref<16x1xf32, #tpu.memory_space<vmem>>, %arg7: memref<16x1xf32, #tpu.memory_space<vmem>>, %arg8: memref<16x128xf32, #tpu.memory_space<vmem>>) attributes {dimension_semantics = [#tpu.dimension_semantics<parallel>, #tpu.dimension_semantics<arbitrary>], iteration_bounds = array<i64: 1, 1>, scalar_prefetch = 0 : i64, scratch_operands = 3 : i64, tpu.core_type = #tpu.core_type<tc>, window_params = [{transform_indices = @transform_0, window_bounds = array<i64: 16, 32>}, {transform_indices = @transform_1, window_bounds = array<i64: 32, 128>}, {transform_indices = @transform_2, window_bounds = array<i64: 1, 128>}, {transform_indices = @transform_3, window_bounds = array<i64: 16, 128>}]} {
    %c0_i32 = arith.constant 0 : i32
    %0 = arith.cmpi eq, %arg1, %c0_i32 : i32
    %1 = arith.extui %0 : i1 to i32
    %c0_i32_0 = arith.constant 0 : i32
    %2 = arith.cmpi ne, %1, %c0_i32_0 : i32
    scf.if %2 {
      %cst_19 = arith.constant 0xFF800000 : f32
      %32 = vector.broadcast %cst_19 : f32 to vector<16x1xf32>
      %c0_20 = arith.constant 0 : index
      %c0_21 = arith.constant 0 : index
      %33 = vector.load %arg6[%c0_20, %c0_21] : memref<16x1xf32, #tpu.memory_space<vmem>>, vector<16x1xf32>
      tpu.vector_store %arg6[%c0_20, %c0_21], %32 {strides = array<i32>} : memref<16x1xf32, #tpu.memory_space<vmem>>, vector<16x1xf32>,
      %cst_22 = arith.constant 0.000000e+00 : f32
      %34 = vector.broadcast %cst_22 : f32 to vector<16x1xf32>
      %c0_23 = arith.constant 0 : index
      %c0_24 = arith.constant 0 : index
      %35 = vector.load %arg7[%c0_23, %c0_24] : memref<16x1xf32, #tpu.memory_space<vmem>>, vector<16x1xf32>
      tpu.vector_store %arg7[%c0_23, %c0_24], %34 {strides = array<i32>} : memref<16x1xf32, #tpu.memory_space<vmem>>, vector<16x1xf32>,
    } else {
    }
    %c0 = arith.constant 0 : index
    %c0_1 = arith.constant 0 : index
    %3 = vector.load %arg2[%c0, %c0_1] : memref<16x32xbf16, #tpu.memory_space<vmem>>, vector<16x32xbf16>
    %c0_2 = arith.constant 0 : index
    %c0_3 = arith.constant 0 : index
    %4 = vector.load %arg3[%c0_2, %c0_3] : memref<32x128xbf16, #tpu.memory_space<vmem>>, vector<32x128xbf16>
    %cst = arith.constant dense<0.000000e+00> : vector<16x128xf32>
    %5 = tpu.matmul %3, %4, %cst {dimension_numbers = #tpu.dot_dimension_numbers<[1], [0], [0], [1], [0, 0, 1, 1], [], []>} : vector<16x32xbf16>, vector<32x128xbf16>, vector<16x128xf32> -> vector<16x128xf32>
    %c0_4 = arith.constant 0 : index
    %c0_5 = arith.constant 0 : index
    %6 = vector.load %arg4[%c0_4, %c0_5] : memref<1x128xf32, #tpu.memory_space<vmem>>, vector<1x128xf32>
    %7 = vector.broadcast %6 : vector<1x128xf32> to vector<16x128xf32>
    %8 = arith.addf %5, %7 : vector<16x128xf32>
    %c0_6 = arith.constant 0 : index
    %c0_7 = arith.constant 0 : index
    %9 = vector.load %arg6[%c0_6, %c0_7] : memref<16x1xf32, #tpu.memory_space<vmem>>, vector<16x1xf32>
    %cst_8 = arith.constant dense<0xFF800000> : vector<16xf32>
    %10 = vector.multi_reduction <maximumf>, %8, %cst_8 [1] : vector<16x128xf32> to vector<16xf32>
    %11 = vector.shape_cast %10 : vector<16xf32> to vector<16x1xf32>
    %12 = arith.maximumf %9, %11 : vector<16x1xf32>
    %c0_9 = arith.constant 0 : index
    %c0_10 = arith.constant 0 : index
    %13 = vector.load %arg7[%c0_9, %c0_10] : memref<16x1xf32, #tpu.memory_space<vmem>>, vector<16x1xf32>
    %14 = arith.subf %9, %12 : vector<16x1xf32>
    %15 = math.exp %14 : vector<16x1xf32>
    %16 = arith.mulf %13, %15 : vector<16x1xf32>
    %17 = vector.broadcast %12 : vector<16x1xf32> to vector<16x128xf32>
    %18 = arith.subf %8, %17 : vector<16x128xf32>
    %19 = math.exp %18 : vector<16x128xf32>
    %cst_11 = arith.constant dense<0.000000e+00> : vector<16xf32>
    %20 = vector.multi_reduction <add>, %19, %cst_11 [1] : vector<16x128xf32> to vector<16xf32>
    %21 = vector.shape_cast %20 : vector<16xf32> to vector<16x1xf32>
    %22 = arith.addf %16, %21 : vector<16x1xf32>
    %c0_12 = arith.constant 0 : index
    %c0_13 = arith.constant 0 : index
    %23 = vector.load %arg7[%c0_12, %c0_13] : memref<16x1xf32, #tpu.memory_space<vmem>>, vector<16x1xf32>
    tpu.vector_store %arg7[%c0_12, %c0_13], %22 {strides = array<i32>} : memref<16x1xf32, #tpu.memory_space<vmem>>, vector<16x1xf32>,
    %c0_14 = arith.constant 0 : index
    %c0_15 = arith.constant 0 : index
    %24 = vector.load %arg6[%c0_14, %c0_15] : memref<16x1xf32, #tpu.memory_space<vmem>>, vector<16x1xf32>
    tpu.vector_store %arg6[%c0_14, %c0_15], %12 {strides = array<i32>} : memref<16x1xf32, #tpu.memory_space<vmem>>, vector<16x1xf32>,
    %c128_i32 = arith.constant 128 : i32
    %25 = arith.muli %arg1, %c128_i32 : i32
    %26 = tpu.assume_multiple %25, 128 : i32
    %c0_16 = arith.constant 0 : index
    %27 = arith.index_cast %26 : i32 to index
    %28 = vector.load %arg8[%c0_16, %27] : memref<16x128xf32, #tpu.memory_space<vmem>>, vector<16x128xf32>
    tpu.vector_store %arg8[%c0_16, %27], %8 {strides = array<i32>} : memref<16x128xf32, #tpu.memory_space<vmem>>, vector<16x128xf32>,
    %c0_i32_17 = arith.constant 0 : i32
    %29 = arith.cmpi eq, %arg1, %c0_i32_17 : i32
    %30 = arith.extui %29 : i1 to i32
    %c0_i32_18 = arith.constant 0 : i32
    %31 = arith.cmpi ne, %30, %c0_i32_18 : i32
    scf.if %31 {
      %c0_19 = arith.constant 0 : index
      %c0_20 = arith.constant 0 : index
      %32 = vector.load %arg6[%c0_19, %c0_20] : memref<16x1xf32, #tpu.memory_space<vmem>>, vector<16x1xf32>
      %c0_21 = arith.constant 0 : index
      %c0_22 = arith.constant 0 : index
      %33 = vector.load %arg7[%c0_21, %c0_22] : memref<16x1xf32, #tpu.memory_space<vmem>>, vector<16x1xf32>
      %34 = math.log %33 : vector<16x1xf32>
      %35 = arith.addf %32, %34 : vector<16x1xf32>
      %c0_23 = arith.constant 0 : index
      %c0_24 = arith.constant 0 : index
      %36 = vector.load %arg8[%c0_23, %c0_24] : memref<16x128xf32, #tpu.memory_space<vmem>>, vector<16x128xf32>
      %37 = vector.broadcast %35 : vector<16x1xf32> to vector<16x128xf32>
      %38 = arith.subf %36, %37 : vector<16x128xf32>
      %39 = arith.truncf %38 : vector<16x128xf32> to vector<16x128xbf16>
      %c0_25 = arith.constant 0 : index
      %c0_26 = arith.constant 0 : index
      %40 = vector.load %arg5[%c0_25, %c0_26] : memref<16x128xbf16, #tpu.memory_space<vmem>>, vector<16x128xbf16>
      tpu.vector_store %arg5[%c0_25, %c0_26], %39 {strides = array<i32>} : memref<16x128xbf16, #tpu.memory_space<vmem>>, vector<16x128xbf16>,
    } else {
    }
    return
  }
  func.func @transform_0(%arg0: i32, %arg1: i32) -> (i32, i32) {
    %c0_i32 = arith.constant 0 : i32
    %c0_i32_0 = arith.constant 0 : i32
    return %arg0, %c0_i32 : i32, i32
  }
  func.func @transform_1(%arg0: i32, %arg1: i32) -> (i32, i32) {
    %c0_i32 = arith.constant 0 : i32
    %c0_i32_0 = arith.constant 0 : i32
    return %c0_i32, %arg1 : i32, i32
  }
  func.func @transform_2(%arg0: i32, %arg1: i32) -> (i32, i32) {
    %c0_i32 = arith.constant 0 : i32
    %c0_i32_0 = arith.constant 0 : i32
    return %c0_i32, %arg1 : i32, i32
  }
  func.func @transform_3(%arg0: i32, %arg1: i32) -> (i32, i32) {
    %c0_i32 = arith.constant 0 : i32
    %c0_i32_0 = arith.constant 0 : i32
    return %arg0, %c0_i32 : i32, i32
  }
}

module attributes {stable_mosaic.version = 11 : i64} {
  func.func @_nsp_kernel(%arg0: memref<2x32xf32, #tpu.memory_space<vmem>>, %arg1: memref<32x2xf32, #tpu.memory_space<vmem>>, %arg2: memref<1x2xf32, #tpu.memory_space<vmem>>, %arg3: memref<2x2xf32, #tpu.memory_space<vmem>>) attributes {dimension_semantics = [], scalar_prefetch = 0 : i64, scratch_operands = 0 : i64, tpu.core_type = #tpu.core_type<tc>} {
    %c0 = arith.constant 0 : index
    %c0_0 = arith.constant 0 : index
    %0 = vector.load %arg0[%c0, %c0_0] : memref<2x32xf32, #tpu.memory_space<vmem>>, vector<2x32xf32>
    %c0_1 = arith.constant 0 : index
    %c0_2 = arith.constant 0 : index
    %1 = vector.load %arg1[%c0_1, %c0_2] : memref<32x2xf32, #tpu.memory_space<vmem>>, vector<32x2xf32>
    %cst = arith.constant dense<0.000000e+00> : vector<2x2xf32>
    %2 = tpu.matmul %0, %1, %cst {dimension_numbers = #tpu.dot_dimension_numbers<[1], [0], [0], [1], [0, 0, 1, 1], [], []>} : vector<2x32xf32>, vector<32x2xf32>, vector<2x2xf32> -> vector<2x2xf32>
    %c0_3 = arith.constant 0 : index
    %c0_4 = arith.constant 0 : index
    %3 = vector.load %arg2[%c0_3, %c0_4] : memref<1x2xf32, #tpu.memory_space<vmem>>, vector<1x2xf32>
    %4 = vector.broadcast %3 : vector<1x2xf32> to vector<2x2xf32>
    %5 = arith.addf %2, %4 : vector<2x2xf32>
    %cst_5 = arith.constant dense<0xFF800000> : vector<2xf32>
    %6 = vector.multi_reduction <maximumf>, %5, %cst_5 [1] : vector<2x2xf32> to vector<2xf32>
    %7 = vector.shape_cast %6 : vector<2xf32> to vector<2x1xf32>
    %8 = vector.broadcast %7 : vector<2x1xf32> to vector<2x2xf32>
    %9 = arith.subf %5, %8 : vector<2x2xf32>
    %10 = math.exp %9 : vector<2x2xf32>
    %cst_6 = arith.constant dense<0.000000e+00> : vector<2xf32>
    %11 = vector.multi_reduction <add>, %10, %cst_6 [1] : vector<2x2xf32> to vector<2xf32>
    %12 = vector.shape_cast %11 : vector<2xf32> to vector<2x1xf32>
    %13 = math.log %12 : vector<2x1xf32>
    %14 = vector.broadcast %13 : vector<2x1xf32> to vector<2x2xf32>
    %15 = arith.subf %9, %14 : vector<2x2xf32>
    %c0_7 = arith.constant 0 : index
    %c0_8 = arith.constant 0 : index
    %16 = vector.load %arg3[%c0_7, %c0_8] : memref<2x2xf32, #tpu.memory_space<vmem>>, vector<2x2xf32>
    tpu.vector_store %arg3[%c0_7, %c0_8], %15 {strides = array<i32>} : memref<2x2xf32, #tpu.memory_space<vmem>>, vector<2x2xf32>,
    return
  }
}

</mosaic_0001>

<bundles_post_ra>
// kernel: bert_lm_heads.3
= control target key start
LH: loop header
LB: loop body
LE: loop exit
PB: predicated region body
PF: predicated region fallthrough
CT: control target
= control target key end

     0   :  { %v276_v1 = vmov 0.0   ;;  %vm277_vm0 = vmmov 0   ;;  %s336_s0 = inlined_call_operand.vmem [shape: bf16[16,32], index: 0, kind: input, shape index: {}]   ;;  %s337_s1 = inlined_call_operand.vmem [shape: bf16[32,128], index: 1, kind: input, shape index: {}]   ;;  %s338_s2 = inlined_call_operand.vmem [shape: f32[1,128], index: 2, kind: input, shape index: {}]   ;;  %s339_s3 = inlined_call_operand.hbm [shape: bf16[16,128], index: 3, kind: output, shape index: {}]  }
   0x1   :  { %v239_v0 = vld [vmem:[%s337_s1 + $0x8] sm:$0xff]   ;;  %222 = vmatprep.subr.bf16.mxu0 %v276_v1  ;;  %v240_v2 = vld [vmem:[%s337_s1] sm:$0xff]   ;;  %226 = vmatprep.mubr.msk.bf16.mxu0 %vm277_vm0, %v276_v1 }
   0x2   :  { %223 = vmatpush3.bf16.msra.mxu0 %v239_v0 }
   0x3   :  { %224 = vmatprep.subr.bf16.mxu0 %v276_v1 }
   0x4   :  { %8 = vsyncpa [#allocation6], 0  ;;  %v241_v3 = vld [vmem:[%s336_s0] sm:$0xff]   ;;  %vm55_vm1 = vcmask 261120   ;;  %vm20_vm2 = vcmask 7168   ;;  %v278_v10 = vmov -inf  }
   0x5   :  { %v205_v4 = vld [vmem:[%s338_s2] ss:$0 sm:$0xff]  ;;  %21 = vst.msk [vmem:[#allocation2] sm:$0xff] %vm20_vm2, %v278_v10  ;;  %22 = vst.msk [vmem:[#allocation2 + $0x8] sm:$0xff] %vm20_vm2, %v278_v10  ;;  %v279_v12 = vmov 0   ;;  %s280_s0 = smov [#allocation5]  }
   0x6   :  { %225 = vmatpush3.bf16.msra.mxu0 %v240_v2  ;;  %23 = vst.msk [vmem:[#allocation3] sm:$0xff] %vm20_vm2, %v276_v1  ;;  %24 = vst.msk [vmem:[#allocation3 + $0x8] sm:$0xff] %vm20_vm2, %v276_v1  ;;  %237 = vset.pattern.permute.xlu1 %v279_v12  ;;  %s193_s1 = sshll.u32 %s280_s0, 4  ;;  %s194_s1 = int_to_ptr.vmem [resolvable:$true] %s193_s1 }
   0x7   :  { %238 = vset.pattern.permute.xlu0 %v279_v12  ;;  %s254_s2 = scalar_lea.vmem %s194_s1, 128  ;;  %p259_p1 = scmp.lt.s32.totalorder %s194_s1, %s194_s1 }
   0x8   :  { %p255_p0 = scmp.ne.s32.totalorder %s194_s1, %s254_s2  ;;  %p260_p2 = scmp.lt.s32.totalorder %s254_s2, %s254_s2 }
   0x9   :  { %227 = vmatmul.mubr.msk.bf16.vlgmr.msra.gmra.mxu0 %vm55_vm1, %v241_v3 }
   0xa   :  { %p261_p3 = por %p260_p2, %p259_p1 }
   0xc   :  { %v100_v13 = vld [vmem:[#allocation2] sm:$0xff]  ;;  %v101_v16 = vld [vmem:[#allocation2 + $0x8] sm:$0xff]  ;;  %p262_p4 = pnand %p261_p3, %p255_p0 }
   0xd   :  { %v108_v32 = vld [vmem:[#allocation3] sm:$0xff]  ;;  %v109_v36 = vld [vmem:[#allocation3 + $0x8] sm:$0xff] }
  0xc9   :  { %v93_v5 = vpop.f32.mrf.mxu0 }
  0xca   :  { %v315_v6 = vadd.f32 %v205_v4, %v93_v5 }
  0xcb   :  { %v228_v7 = vpop.f32.mrf.mxu0 }
  0xcc   :  { %102 = vmax.xlane.f32.xlu0 %v315_v6 }
  0xcd   :  { %v96_v8 = vpop.f32.mrf.mxu0 }
  0xce   :  { %v318_v9 = vadd.f32 %v205_v4, %v96_v8 }
  0xcf   :  { %v229_v11 = vpop.f32.mrf.mxu0 }
  0xd0   :  { %104 = vmax.xlane.f32.xlu0 %v318_v9 }
 0x155   :  { %v103_v14 = vpop.xlane.xlu0 %102 }
 0x156   :  { %v106_v15 = vmax.f32 %v100_v13, %v103_v14 }
 0x158   :  { %v110_v17 = vsub.f32 %v100_v13, %v106_v15  ;;  %143 = vst.msk [vmem:[#allocation2] sm:$0xff] %vm20_vm2, %v106_v15  ;;  %120 = vperm.xlu1 %237, %v106_v15  }
 0x159   :  { %v105_v18 = vpop.xlane.xlu0 %104 }
 0x15a   :  { %v107_v19 = vmax.f32 %v101_v16, %v105_v18  ;;  %v112_v29 = vmul.f32 1.442695, %v110_v17 }
 0x15c   :  { %v111_v20 = vsub.f32 %v101_v16, %v107_v19  ;;  %144 = vst.msk [vmem:[#allocation2 + $0x8] sm:$0xff] %vm20_vm2, %v107_v19  ;;  %125 = vperm.xlu1 %237, %v107_v19  }
 0x15e   :  { %v114_v30 = vmul.f32 1.442695, %v111_v20 }
 0x15f   :  { %v154_v45 = vld [vmem:[#allocation2] sm:$0xff] }
 0x163   :  { %v155_v49 = vld [vmem:[#allocation2 + $0x8] sm:$0xff] }
 0x1d3   :  { %v121_v21 = vpop.permute.xlu1 %120 }
 0x1d4   :  { %v128_v22 = vsub.f32 %v315_v6, %v121_v21 }
 0x1d6   :  { %v130_v23 = vmul.f32 1.442695, %v128_v22 }
 0x1d7   :  { %v126_v24 = vpop.permute.xlu1 %125 }
 0x1d8   :  { %242 = vpow2.f32 %v130_v23  ;;  %v129_v25 = vsub.f32 %v318_v9, %v126_v24 }
 0x1da   :  { %v132_v26 = vmul.f32 1.442695, %v129_v25 }
 0x1dc   :  { %244 = vpow2.f32 %v132_v26 }
 0x1dd   :  { %246 = vpow2.f32 %v112_v29 }
 0x1de   :  { %248 = vpow2.f32 %v114_v30 }
 0x1e5   :  { %v243_v27 = vpop.eup %242 }
 0x1e6   :  { %134 = vadd.xlane.f32.xlu0 %v243_v27 }
 0x1e9   :  { %v245_v28 = vpop.eup %244 }
 0x1ea   :  { %136 = vadd.xlane.f32.xlu1 %v245_v28  ;;  %v247_v31 = vpop.eup %246 }
 0x1eb   :  { %v116_v33 = vmul.f32 %v247_v31, %v108_v32  ;;  %v249_v34 = vpop.eup %248 }
 0x1ec   :  { %v117_v38 = vmul.f32 %v249_v34, %v109_v36 }
 0x26f   :  { %v135_v35 = vpop.xlane.xlu0 %134 }
 0x270   :  { %v138_v37 = vadd.f32 %v135_v35, %v116_v33 }
 0x272   :  { %141 = vst.msk [vmem:[#allocation3] sm:$0xff] %vm20_vm2, %v138_v37 }
 0x273   :  { %v137_v39 = vpop.xlane.xlu1 %136 }
 0x274   :  { %v139_v40 = vadd.f32 %v137_v39, %v117_v38 }
 0x276   :  { %142 = vst.msk [vmem:[#allocation3 + $0x8] sm:$0xff] %vm20_vm2, %v139_v40 }
 0x279   :  { %v156_v41 = vld [vmem:[#allocation3] sm:$0xff] }
 0x27a   :  { %250 = vlog2.f32 %v156_v41 }
 0x27d   :  { %v157_v42 = vld [vmem:[#allocation3 + $0x8] sm:$0xff] }
 0x27e   :  { %252 = vlog2.f32 %v157_v42 }
 0x287   :  { %v251_v43 = vpop.eup %250 }
 0x288   :  { %v159_v44 = vmul.f32 0.6931472, %v251_v43 }
 0x28a   :  { %v162_v46 = vadd.f32 %v159_v44, %v154_v45 }
 0x28b   :  { %v253_v47 = vpop.eup %252 }
 0x28c   :  { %168 = vperm.xlu0 %238, %v162_v46   ;;  %v161_v48 = vmul.f32 0.6931472, %v253_v47 }
 0x28e   :  { %v163_v50 = vadd.f32 %v161_v48, %v155_v49 }
 0x290   :  { %173 = vperm.xlu1 %237, %v163_v50  }
 0x307   :  { %v169_v51 = vpop.permute.xlu0 %168 }
 0x308   :  { %v176_v53 = vsub.f32 %v315_v6, %v169_v51 }
 0x30b   :  { %v174_v52 = vpop.permute.xlu1 %173 }
 0x30c   :  { %v177_v54 = vsub.f32 %v318_v9, %v174_v52 }
 0x30e   :  { %v217_v55 = vpack.c.bf16 %v177_v54, %v176_v53 }
 0x310   :  { %218 = vst [vmem:[#allocation5] sm:$0xff] %v217_v55  }
 0x311   :  { %265 = shalt.err (!%p262_p4)
}
 0x312   :  { %s281_s20 = smov 64   ;;  %s282_s21 = smov 4  }
 0x313   :  { %199 = dma.vmem_to_hbm [thread:$0]  %s194_s1, 128, %s339_s3, [#allocation6], %s281_s20, %s281_s20, %s282_s21  }
 0x314   :  { %274 = dma.done.wait [#allocation6], 128  }
 0x315   :  { %275 = vsyncadd [#allocation6], 4294967168 }
 0x316   :  { %203 = vsyncpa [#allocation6], 1 }

// kernel: bert_lm_heads.2
= control target key start
LH: loop header
LB: loop body
LE: loop exit
PB: predicated region body
PF: predicated region fallthrough
CT: control target
= control target key end

     0   :  { %v176_v1 = vmov 0.0   ;;  %vm177_vm0 = vmmov 0   ;;  %s223_s0 = inlined_call_operand.vmem [shape: f32[2,32], index: 0, kind: input, shape index: {}]   ;;  %s224_s1 = inlined_call_operand.vmem [shape: f32[32,2], index: 1, kind: input, shape index: {}]   ;;  %s225_s2 = inlined_call_operand.vmem [shape: f32[1,2], index: 2, kind: input, shape index: {}]   ;;  %s226_s3 = inlined_call_operand.hbm [shape: f32[2,2], index: 3, kind: output, shape index: {}]  }
   0x1   :  { %v19_v0 = vld [vmem:[%s224_s1 + $0x18] sm:$0xff]  ;;  %136 = vmatprep.subr.mxu0 %v176_v1  ;;  %v18_v2 = vld [vmem:[%s224_s1 + $0x10] sm:$0xff]  ;;  %144 = vmatprep.mubr.msk.f32.mxu0 %vm177_vm0, %v176_v1 }
   0x2   :  { %137 = vmatpush3.msra.mxu0 %v19_v0 }
   0x3   :  { %8 = vsyncpa [#allocation3], 0  ;;  %138 = vmatprep.subr.mxu0 %v176_v1  ;;  %v17_v3 = vld [vmem:[%s224_s1 + $0x8] sm:$0xff]  ;;  %v16_v4 = vld [vmem:[%s224_s1] sm:$0xff]  ;;  %vm27_vm1 = vcmask 261120   ;;  %vm101_vm2 = vcmask 9216  }
   0x4   :  { %139 = vmatpush3.msra.mxu0 %v18_v2  ;;  %v15_v5 = vld [vmem:[%s223_s0] sm:$0x3]  ;;  %s178_s0 = smov [#allocation2]  }
   0x5   :  { %140 = vmatprep.subr.mxu0 %v176_v1  ;;  %v129_v6 = vld [vmem:[%s225_s2] ss:$0 sm:$0xff]  ;;  %s121_s1 = sshll.u32 %s178_s0, 4  ;;  %s122_s1 = int_to_ptr.vmem [resolvable:$true] %s121_s1 }
   0x6   :  { %141 = vmatpush3.msra.mxu0 %v17_v3  ;;  %s154_s2 = scalar_lea.vmem %s122_s1, 32  ;;  %p159_p1 = scmp.lt.s32.totalorder %s122_s1, %s122_s1 }
   0x7   :  { %142 = vmatprep.subr.mxu0 %v176_v1  ;;  %p155_p0 = scmp.ne.s32.totalorder %s122_s1, %s154_s2  ;;  %p160_p2 = scmp.lt.s32.totalorder %s154_s2, %s154_s2 }
   0x8   :  { %143 = vmatpush3.msra.mxu0 %v16_v4 }
   0x9   :  { %145 = vmatmul.mubr.msk.f32.vlgmr.msra.gmra.mxu0 %vm27_vm1, %v15_v5  ;;  %p161_p3 = por %p160_p2, %p159_p1 }
   0xb   :  { %p162_p4 = pnand %p161_p3, %p155_p0 }
  0xc9   :  { %v97_v7 = vpop.f32.mrf.mxu0 }
  0xca   :  { %v98_v8 = vadd.f32 %v129_v6, %v97_v7 }
  0xcb   :  { %v146_v9 = vpop.f32.mrf.mxu0 }
  0xcc   :  { %v102_v10 = vsel %vm101_vm2, %v98_v8, -inf }
  0xcd   :  { %103 = vmax.xlane.f32.xlu0 %v102_v10 }
 0x156   :  { %v104_v11 = vpop.xlane.xlu0 %103 }
 0x157   :  { %v105_v12 = vsub.f32 %v98_v8, %v104_v11 }
 0x159   :  { %v106_v13 = vmul.f32 1.442695, %v105_v12 }
 0x15b   :  { %150 = vpow2.f32 %v106_v13 }
 0x168   :  { %v151_v14 = vpop.eup %150 }
 0x169   :  { %v108_v15 = vsel %vm101_vm2, %v151_v14, 0.0 }
 0x16a   :  { %109 = vadd.xlane.f32.xlu0 %v108_v15 }
 0x1f3   :  { %v110_v16 = vpop.xlane.xlu0 %109 }
 0x1f4   :  { %152 = vlog2.f32 %v110_v16 }
 0x201   :  { %v153_v17 = vpop.eup %152 }
 0x202   :  { %v112_v18 = vmul.f32 0.6931472, %v153_v17 }
 0x204   :  { %v113_v19 = vsub.f32 %v105_v12, %v112_v18 }
 0x206   :  { %114 = vst.msk [vmem:[#allocation2] sm:$0x3] %vm101_vm2, %v113_v19 }
 0x207   :  { %165 = shalt.err (!%p162_p4)
}
 0x208   :  { %124 = dma.vmem_to_hbm [thread:$0]  %s122_s1, 32, %s226_s3, [#allocation3]  }
 0x209   :  { %174 = dma.done.wait [#allocation3], 32  }
 0x20a   :  { %175 = vsyncadd [#allocation3], 4294967264 }
 0x20b   :  { %128 = vsyncpa [#allocation3], 1 }

</bundles_post_ra>
